<compile_context>
chip_gen: v7x
topology: tpu7x:2x2x1
jax: 0.10.0
libtpu: 0.0.40
codegen_flags: <defaults>
</compile_context>

<pallas_src>
import numpy as np

import jax
import jax.numpy as jnp
from jax.experimental import pallas as pl
from jax.experimental.pallas import tpu as pltpu


# Fixed architecture constants (match Net / nn.Linear(32, 2)).
IN_CH, IN_H, IN_W = 3, 8, 8
IN_FEATURES = IN_CH * IN_H * IN_W          # 192
H1_FEATURES = 4 * 4 * 4                    # conv1 output, NCHW-flattened: 64
H2_FEATURES = 8 * 2 * 2                    # conv2 output, NCHW-flattened: 32
NUM_CLASSES = 2
LANE = 128                                  # lane-dense padded width

# Row offsets of the three weight regions inside the packed bf16 slab.
# All offsets are multiples of 16 -> bf16 (16,128) tile aligned.
R1_END = IN_FEATURES                        # w1: rows [0,192), lanes [0,64) used
R2_END = R1_END + H1_FEATURES               # w2: rows [192,256), lanes [0,32) used
R3_END = R2_END + H2_FEATURES               # wc: rows [256,288), lanes [0,128)
SLAB_ROWS = R3_END                          # 288


# ---------------------------------------------------------------------------
# Fused Pallas kernel: conv1 -> ReLU -> conv2 -> ReLU -> classifier
# (convs pre-lowered at init to dense matrices on NCHW-flattened activations)
# ---------------------------------------------------------------------------
def _fused_net_kernel(x_ref, p_ref, b_ref, o_ref):
    # conv1 as dense matmul: (Np,192)bf16 @ (192,128)bf16 -> (Np,128)f32.
    # Weight lanes [64,128) are zero, so those output lanes stay exactly 0.
    x = x_ref[...].astype(jnp.bfloat16)
    h = jnp.dot(x, p_ref[0:R1_END, :], preferred_element_type=jnp.float32)
    h = jnp.maximum(h + b_ref[0:1, :], 0.0)                  # bias/ReLU in f32

    # conv2 as dense matmul: (Np,64)bf16 @ (64,128)bf16 -> (Np,128)f32.
    h = jnp.dot(h[:, :H1_FEATURES].astype(jnp.bfloat16),
                p_ref[R1_END:R2_END, :], preferred_element_type=jnp.float32)
    h = jnp.maximum(h + b_ref[1:2, :], 0.0)

    # classifier (padded to 128 lanes): (Np,32)bf16 @ (32,128)bf16 -> (Np,128).
    out = jnp.dot(h[:, :H2_FEATURES].astype(jnp.bfloat16),
                  p_ref[R2_END:R3_END, :], preferred_element_type=jnp.float32)
    o_ref[...] = (out + b_ref[2:3, :]).astype(o_ref.dtype)   # lane-dense store


def fused_net(fparams, x_pad):
    """x_pad: (Np, 192) f32 NCHW-flattened images (Np % 8 == 0) -> (Np, 128)."""
    n_pad, k = x_pad.shape
    assert k == IN_FEATURES and n_pad % 8 == 0, (x_pad.shape,)
    assert fparams["pslab"].shape == (SLAB_ROWS, LANE)
    vmem = lambda: pl.BlockSpec(memory_space=pltpu.MemorySpace.VMEM)
    return pl.pallas_call(
        _fused_net_kernel,
        out_shape=jax.ShapeDtypeStruct((n_pad, LANE), jnp.float32),
        in_specs=[vmem(), vmem(), vmem()],
        out_specs=vmem(),
    )(x_pad, fparams["pslab"], fparams["bslab"])


def net_forward(fparams, image_nchw):
    """Full Net forward.  image_nchw: (N, 3, 8, 8) -> dict with (N, 2) logits."""
    n = image_nchw.shape[0]
    # torch-order (NCHW) flatten: a plain contiguous reshape, no transpose.
    x_flat = image_nchw.astype(jnp.float32).reshape(n, IN_FEATURES)
    # Pad the batch/sublane dim to a multiple of 8 -> full vregs, unmasked store.
    n_pad = max(8, ((n + 7) // 8) * 8)
    if n_pad != n:
        x_flat = jnp.pad(x_flat, ((0, n_pad - n), (0, 0)))
    out_pad = fused_net(fparams, x_flat)
    logits = out_pad[:n, :NUM_CLASSES]
    # TODO(synk): trw.train.OutputClassification is a training-loop wrapper
    # (loss/metrics bookkeeping), not compute; raw logits are returned instead.
    return {"fake_symbols_2d": logits}


# ---------------------------------------------------------------------------
# Init-time parameter preparation (one-off, outside the hot path)
# ---------------------------------------------------------------------------
def init_params(key):
    """Self-initialized params in the PyTorch layouts (conv: OIHW)."""
    k1, k2, k3, k4, k5, k6 = jax.random.split(key, 6)
    return {
        "w1": jax.random.normal(k1, (4, 3, 5, 5), jnp.float32) * 0.1,   # OIHW
        "b1": jax.random.normal(k2, (4,), jnp.float32) * 0.1,
        "w2": jax.random.normal(k3, (8, 4, 5, 5), jnp.float32) * 0.1,   # OIHW
        "b2": jax.random.normal(k4, (8,), jnp.float32) * 0.1,
        "w_cls": jax.random.normal(k5, (32, 2), jnp.float32) * 0.1,     # (in, out)
        "b_cls": jax.random.normal(k6, (2,), jnp.float32) * 0.1,
    }


def _conv_as_dense(w_oihw, b, hin, win, stride, pad):
    """Lower a small Conv2d to a dense matrix on NCHW-flattened vectors.

    Returns (M, b_full, hout, wout) with M of shape (Cin*Hin*Win, Cout*Ho*Wo)
    such that  flatten_nchw(conv(x)) == flatten_nchw(x) @ M + b_full.
    """
    w = np.asarray(w_oihw, np.float32)
    cout, cin, kh, kw = w.shape
    hout = (hin + 2 * pad - kh) // stride + 1
    wout = (win + 2 * pad - kw) // stride + 1
    m = np.zeros((cin * hin * win, cout * hout * wout), np.float32)
    for co in range(cout):
        for ho in range(hout):
            for wo in range(wout):
                col = (co * hout + ho) * wout + wo
                for ci in range(cin):
                    for i in range(kh):
                        hi = ho * stride + i - pad
                        if hi < 0 or hi >= hin:
                            continue
                        for j in range(kw):
                            wi = wo * stride + j - pad
                            if wi < 0 or wi >= win:
                                continue
                            row = (ci * hin + hi) * win + wi
                            m[row, col] = w[co, ci, i, j]
    b_full = np.repeat(np.asarray(b, np.float32), hout * wout)
    return m, b_full, hout, wout


def prepare_fused_params(params):
    """Fold convs into dense matrices and pack everything into two buffers:
       one (288,128) bf16 weight slab + one (8,128) f32 bias tile."""
    w1m, b1f, h1, w1s = _conv_as_dense(params["w1"], params["b1"],
                                       IN_H, IN_W, stride=2, pad=2)   # (192,64)
    w2m, b2f, _, _ = _conv_as_dense(params["w2"], params["b2"],
                                    h1, w1s, stride=2, pad=2)         # (64,32)
    wc = np.asarray(params["w_cls"], np.float32)                       # (32,2)
    bc = np.asarray(params["b_cls"], np.float32)                       # (2,)
    assert w1m.shape == (IN_FEATURES, H1_FEATURES)
    assert w2m.shape == (H1_FEATURES, H2_FEATURES)

    pslab = np.zeros((SLAB_ROWS, LANE), np.float32)
    pslab[0:R1_END, 0:H1_FEATURES] = w1m
    pslab[R1_END:R2_END, 0:H2_FEATURES] = w2m
    pslab[R2_END:R3_END, 0:NUM_CLASSES] = wc

    bslab = np.zeros((8, LANE), np.float32)       # biases stay f32 (one tile)
    bslab[0, 0:H1_FEATURES] = b1f
    bslab[1, 0:H2_FEATURES] = b2f
    bslab[2, 0:NUM_CLASSES] = bc

    return {
        "pslab": jnp.asarray(pslab, jnp.bfloat16),    # single bf16 weight DMA
        "bslab": jnp.asarray(bslab, jnp.float32),     # single 4 KiB bias DMA
    }


# ---------------------------------------------------------------------------
# References (validation only)
# ---------------------------------------------------------------------------
def _reference_forward(params, image_nchw):
    """Exact f32 semantics of the original torch module."""
    x = image_nchw.astype(jnp.float32)

    def conv_relu(x, w, b):
        y = jax.lax.conv_general_dilated(
            x, w, window_strides=(2, 2), padding=((2, 2), (2, 2)),
            dimension_numbers=("NCHW", "OIHW", "NCHW"),
            precision=jax.lax.Precision.HIGHEST)
        return jax.nn.relu(y + b.reshape(1, -1, 1, 1))

    x = conv_relu(x, params["w1"], params["b1"])     # (N,4,4,4)
    x = conv_relu(x, params["w2"], params["b2"])     # (N,8,2,2)
    x = x.reshape(x.shape[0], -1)                    # NCHW flatten -> (N,32)
    return jnp.dot(x, params["w_cls"],
                   precision=jax.lax.Precision.HIGHEST) + params["b_cls"]


def _matched_reference(fparams, x_pad):
    """Quantization-matched (bf16 operands, f32 accumulate) pure-XLA mirror of
    the kernel dataflow, for a tight numerical check."""
    p, b = fparams["pslab"], fparams["bslab"]
    h = jnp.dot(x_pad.astype(jnp.bfloat16), p[0:R1_END],
                preferred_element_type=jnp.float32)
    h = jnp.maximum(h + b[0:1], 0.0)
    h = jnp.dot(h[:, :H1_FEATURES].astype(jnp.bfloat16), p[R1_END:R2_END],
                preferred_element_type=jnp.float32)
    h = jnp.maximum(h + b[1:2], 0.0)
    out = jnp.dot(h[:, :H2_FEATURES].astype(jnp.bfloat16), p[R2_END:R3_END],
                  preferred_element_type=jnp.float32)
    return out + b[2:3]


if __name__ == "__main__":
    key = jax.random.PRNGKey(0)
    pkey, xkey = jax.random.split(key)
    params = init_params(pkey)
    fparams = prepare_fused_params(params)

    # batch=2, channels=3, spatial=8x8 (two stride-2 convs -> 8*2*2 = 32
    # flattened features, matching nn.Linear(32, 2)).
    image = jax.random.normal(xkey, (2, IN_CH, IN_H, IN_W), jnp.float32)

    fwd = jax.jit(net_forward)
    out = fwd(fparams, image)
    logits = jax.block_until_ready(out["fake_symbols_2d"])
    assert logits.shape == (2, NUM_CLASSES), logits.shape
    assert logits.dtype == jnp.float32

    # 1) Tight check against a quantization-matched XLA mirror of the kernel
    #    (same bf16 weights/operands, same f32 accumulation).
    x_pad = jnp.pad(image.reshape(2, IN_FEATURES).astype(jnp.float32),
                    ((0, 6), (0, 0)))
    matched = jax.block_until_ready(
        _matched_reference(fparams, x_pad))[:2, :NUM_CLASSES]
    assert jnp.allclose(logits, matched, rtol=1e-3, atol=1e-3), (logits, matched)

    # 2) Check against the exact f32 module semantics.  Tolerance accounts for
    #    the bf16 weight/activation quantization adopted per the perf review
    #    (~1e-3 absolute at these magnitudes).
    ref = jax.block_until_ready(_reference_forward(params, image))
    assert jnp.allclose(logits, ref, rtol=5e-2, atol=1e-2), (logits, ref)

    print("KERNEL_OK")
</pallas_src>

<mosaic_0001>
module attributes {stable_mosaic.version = 11 : i64} {
  func.func @_fused_net_kernel(%arg0: memref<8x192xf32, #tpu.memory_space<vmem>>, %arg1: memref<288x128xbf16, #tpu.memory_space<vmem>>, %arg2: memref<8x128xf32, #tpu.memory_space<vmem>>, %arg3: memref<8x128xf32, #tpu.memory_space<vmem>>) attributes {dimension_semantics = [], scalar_prefetch = 0 : i64, scratch_operands = 0 : i64, tpu.core_type = #tpu.core_type<tc>} {
    %c0 = arith.constant 0 : index
    %c0_0 = arith.constant 0 : index
    %0 = vector.load %arg0[%c0, %c0_0] : memref<8x192xf32, #tpu.memory_space<vmem>>, vector<8x192xf32>
    %1 = arith.truncf %0 : vector<8x192xf32> to vector<8x192xbf16>
    %c0_1 = arith.constant 0 : index
    %c0_2 = arith.constant 0 : index
    %2 = vector.load %arg1[%c0_1, %c0_2] : memref<288x128xbf16, #tpu.memory_space<vmem>>, vector<192x128xbf16>
    %cst = arith.constant dense<0.000000e+00> : vector<8x128xf32>
    %3 = tpu.matmul %1, %2, %cst {dimension_numbers = #tpu.dot_dimension_numbers<[1], [0], [0], [1], [0, 0, 1, 1], [], []>} : vector<8x192xbf16>, vector<192x128xbf16>, vector<8x128xf32> -> vector<8x128xf32>
    %c0_3 = arith.constant 0 : index
    %c0_4 = arith.constant 0 : index
    %4 = vector.load %arg2[%c0_3, %c0_4] : memref<8x128xf32, #tpu.memory_space<vmem>>, vector<1x128xf32>
    %5 = vector.broadcast %4 : vector<1x128xf32> to vector<8x128xf32>
    %6 = arith.addf %3, %5 : vector<8x128xf32>
    %cst_5 = arith.constant 0.000000e+00 : f32
    %7 = vector.broadcast %cst_5 : f32 to vector<8x128xf32>
    %8 = arith.maximumf %6, %7 : vector<8x128xf32>
    %9 = vector.extract_strided_slice %8 {offsets = [0, 0], sizes = [8, 64], strides = [1, 1]} : vector<8x128xf32> to vector<8x64xf32>
    %10 = arith.truncf %9 : vector<8x64xf32> to vector<8x64xbf16>
    %c192 = arith.constant 192 : index
    %c0_6 = arith.constant 0 : index
    %11 = vector.load %arg1[%c192, %c0_6] : memref<288x128xbf16, #tpu.memory_space<vmem>>, vector<64x128xbf16>
    %cst_7 = arith.constant dense<0.000000e+00> : vector<8x128xf32>
    %12 = tpu.matmul %10, %11, %cst_7 {dimension_numbers = #tpu.dot_dimension_numbers<[1], [0], [0], [1], [0, 0, 1, 1], [], []>} : vector<8x64xbf16>, vector<64x128xbf16>, vector<8x128xf32> -> vector<8x128xf32>
    %c1 = arith.constant 1 : index
    %c0_8 = arith.constant 0 : index
    %13 = vector.load %arg2[%c1, %c0_8] : memref<8x128xf32, #tpu.memory_space<vmem>>, vector<1x128xf32>
    %14 = vector.broadcast %13 : vector<1x128xf32> to vector<8x128xf32>
    %15 = arith.addf %12, %14 : vector<8x128xf32>
    %cst_9 = arith.constant 0.000000e+00 : f32
    %16 = vector.broadcast %cst_9 : f32 to vector<8x128xf32>
    %17 = arith.maximumf %15, %16 : vector<8x128xf32>
    %18 = vector.extract_strided_slice %17 {offsets = [0, 0], sizes = [8, 32], strides = [1, 1]} : vector<8x128xf32> to vector<8x32xf32>
    %19 = arith.truncf %18 : vector<8x32xf32> to vector<8x32xbf16>
    %c256 = arith.constant 256 : index
    %c0_10 = arith.constant 0 : index
    %20 = vector.load %arg1[%c256, %c0_10] : memref<288x128xbf16, #tpu.memory_space<vmem>>, vector<32x128xbf16>
    %cst_11 = arith.constant dense<0.000000e+00> : vector<8x128xf32>
    %21 = tpu.matmul %19, %20, %cst_11 {dimension_numbers = #tpu.dot_dimension_numbers<[1], [0], [0], [1], [0, 0, 1, 1], [], []>} : vector<8x32xbf16>, vector<32x128xbf16>, vector<8x128xf32> -> vector<8x128xf32>
    %c2 = arith.constant 2 : index
    %c0_12 = arith.constant 0 : index
    %22 = vector.load %arg2[%c2, %c0_12] : memref<8x128xf32, #tpu.memory_space<vmem>>, vector<1x128xf32>
    %23 = vector.broadcast %22 : vector<1x128xf32> to vector<8x128xf32>
    %24 = arith.addf %21, %23 : vector<8x128xf32>
    %c0_13 = arith.constant 0 : index
    %c0_14 = arith.constant 0 : index
    %25 = vector.load %arg3[%c0_13, %c0_14] : memref<8x128xf32, #tpu.memory_space<vmem>>, vector<8x128xf32>
    tpu.vector_store %arg3[%c0_13, %c0_14], %24 {strides = array<i32>} : memref<8x128xf32, #tpu.memory_space<vmem>>, vector<8x128xf32>,
    return
  }
}

</mosaic_0001>

<bundles_post_ra>
// kernel: net_forward.1
= control target key start
LH: loop header
LB: loop body
LE: loop exit
PB: predicated region body
PF: predicated region fallthrough
CT: control target
= control target key end

     0   :  { %8 = vsyncpa [#allocation3], 0  ;;  %s433_s12 = smov [#allocation2]   ;;  %s499_s0 = inlined_call_operand.vmem [shape: f32[8,192], index: 0, kind: input, shape index: {}]   ;;  %s500_s1 = inlined_call_operand.hbm [shape: bf16[288,128], index: 1, kind: input, shape index: {}]   ;;  %s501_s2 = inlined_call_operand.vmem [shape: f32[8,128], index: 2, kind: input, shape index: {}]   ;;  %s502_s3 = inlined_call_operand.vmem [shape: f32[8,128], index: 3, kind: output, shape index: {}]  }
   0x1   :  { %s16_s13 = sshll.u32 %s433_s12, 4  ;;  %s409_s16 = scalar_lea.hbm %s500_s1, 2304  ;;  %s17_s13 = int_to_ptr.vmem [resolvable:$true] %s16_s13 }
   0x2   :  { %p410_p0 = scmp.ne.s32.totalorder %s500_s1, %s409_s16  ;;  %p413_p1 = scmp.lt.u32.totalorder %s409_s16, %s500_s1 }
   0x4   :  { %p415_p2 = pnand %p413_p1, %p410_p0 }
   0x6   :  { %418 = shalt.err (!%p415_p2)
}
   0x7   :  { %s419_s21 = scalar_lea.vmem %s17_s13, 2304  ;;  %p424_p4 = scmp.lt.s32.totalorder %s17_s13, %s17_s13 }
   0x8   :  { %p420_p3 = scmp.ne.s32.totalorder %s17_s13, %s419_s21  ;;  %p425_p5 = scmp.lt.s32.totalorder %s419_s21, %s419_s21 }
   0xa   :  { %p426_p6 = por %p425_p5, %p424_p4 }
   0xc   :  { %p427_p7 = pnand %p426_p6, %p420_p3 }
   0xe   :  { %430 = shalt.err (!%p427_p7)
}
   0xf   :  { %s434_s22 = smov 64   ;;  %s435_s23 = smov 4  }
  0x10   :  { %22 = dma.hbm_to_vmem [thread:$0]  %s500_s1, 2304, %s17_s13, [#allocation3], %s434_s22, %s434_s22, %s435_s23  }
  0x11   :  { %431 = dma.done.wait [#allocation3], 2304  }
  0x12   :  { %432 = vsyncadd [#allocation3], 4294964992  ;;  %v436_v0 = vmov 0   ;;  %v437_v1 = vmov 0.0   ;;  %v391_v2 = vld [vmem:[#allocation2] sm:$0xff]   ;;  %v392_v3 = vld [vmem:[#allocation2 + $0x8] sm:$0xff]  }
  0x13   :  { %138 = vmatprep.subr.bf16.mxu0 %v436_v0  ;;  %365 = vmatprep.subr.bf16.mxu1 %v437_v1  ;;  %v393_v4 = vld [vmem:[#allocation2 + $0x10] sm:$0xff]   ;;  %v394_v5 = vld [vmem:[#allocation2 + $0x18] sm:$0xff]   ;;  %v30_v6 = vld [vmem:[%s499_s0 + $0x8] sm:$0xff]  ;;  %vm134_vm0 = vcmask 523264   ;;  %vm438_vm1 = vmmov 0   ;;  %vm283_vm2 = vcmask 261120  }
  0x14   :  { %139 = vmatpush1.bf16.msra.mxu0 %v391_v2  ;;  %v32_v7 = vpack.c.bf16 %v30_v6, %v30_v6  ;;  %v403_v8 = vld [vmem:[#allocation2 + $0x60] sm:$0xff]   ;;  %v404_v10 = vld [vmem:[#allocation2 + $0x68] sm:$0xff]   ;;  %v397_v12 = vld [vmem:[#allocation2 + $0x30] sm:$0xff]   ;;  %373 = vmatprep.mubr.msk.bf16.mxu1 %vm438_vm1, %v437_v1 }
  0x15   :  { %140 = vmatprep.subr.bf16.mxu0 %v436_v0  ;;  %v395_v9 = vld [vmem:[#allocation2 + $0x20] sm:$0xff]   ;;  %366 = vmatpush3.bf16.msra.mxu1 %v403_v8  ;;  %v396_v11 = vld [vmem:[#allocation2 + $0x28] sm:$0xff]   ;;  %v398_v13 = vld [vmem:[#allocation2 + $0x38] sm:$0xff]  }
  0x16   :  { %346 = vmatprep.mubr.msk.bf16.mxu0 %vm134_vm0, %v32_v7  ;;  %367 = vmatprep.subr.bf16.mxu1 %v437_v1  ;;  %v399_v14 = vld [vmem:[#allocation2 + $0x40] sm:$0xff]   ;;  %v400_v15 = vld [vmem:[#allocation2 + $0x48] sm:$0xff]   ;;  %v401_v16 = vld [vmem:[#allocation2 + $0x50] sm:$0xff]  }
  0x17   :  { %v402_v17 = vld [vmem:[#allocation2 + $0x58] sm:$0xff]   ;;  %v29_v18 = vld [vmem:[%s499_s0] sm:$0xff]  ;;  %v405_v20 = vld [vmem:[#allocation2 + $0x70] sm:$0xff]  }
  0x18   :  { %141 = vmatpush1.bf16.msra.mxu0 %v392_v3  ;;  %v31_v19 = vpack.c.bf16 %v29_v18, %v29_v18  ;;  %v406_v21 = vld [vmem:[#allocation2 + $0x78] sm:$0xff]   ;;  %v333_v22 = vld [vmem:[%s501_s2] ss:$0 sm:$0xff]  ;;  %v408_v31 = vld [vmem:[#allocation2 + $0x88] sm:$0xff]  }
  0x19   :  { %142 = vmatprep.subr.bf16.mxu0 %v436_v0  ;;  %368 = vmatpush3.bf16.msra.mxu1 %v404_v10  ;;  %v407_v29 = vld [vmem:[#allocation2 + $0x80] sm:$0xff]  }
  0x1a   :  { %369 = vmatprep.subr.bf16.mxu1 %v437_v1  ;;  %v347_v32 = vld [vmem:[%s501_s2 + $0x1] ss:$0 sm:$0xff]  ;;  %v353_v40 = vld [vmem:[%s501_s2 + $0x2] ss:$0 sm:$0xff] }
  0x1c   :  { %143 = vmatpush1.bf16.msra.mxu0 %v393_v4 }
  0x1d   :  { %144 = vmatprep.subr.bf16.mxu0 %v436_v0  ;;  %370 = vmatpush3.bf16.msra.mxu1 %v405_v20 }
  0x1e   :  { %371 = vmatprep.subr.bf16.mxu1 %v437_v1 }
  0x20   :  { %145 = vmatpush1.bf16.msra.mxu0 %v394_v5 }
  0x21   :  { %146 = vmatprep.subr.bf16.mxu0 %v436_v0  ;;  %372 = vmatpush3.bf16.msra.mxu1 %v406_v21 }
  0x22   :  { %377 = vmatprep.subr.bf16.mxu1 %v437_v1 }
  0x24   :  { %147 = vmatpush1.bf16.msra.mxu0 %v395_v9 }
  0x25   :  { %148 = vmatprep.subr.bf16.mxu0 %v436_v0 }
  0x28   :  { %149 = vmatpush1.bf16.msra.mxu0 %v396_v11 }
  0x29   :  { %150 = vmatprep.subr.bf16.mxu0 %v436_v0 }
  0x2c   :  { %151 = vmatpush1.bf16.msra.mxu0 %v397_v12 }
  0x2d   :  { %152 = vmatprep.subr.bf16.mxu0 %v436_v0 }
  0x30   :  { %153 = vmatpush1.bf16.msra.mxu0 %v398_v13 }
  0x31   :  { %154 = vmatprep.subr.bf16.mxu0 %v436_v0 }
  0x34   :  { %155 = vmatpush1.bf16.msra.mxu0 %v399_v14 }
  0x35   :  { %156 = vmatprep.subr.bf16.mxu0 %v436_v0 }
  0x38   :  { %157 = vmatpush1.bf16.msra.mxu0 %v400_v15 }
  0x39   :  { %158 = vmatprep.subr.bf16.mxu0 %v436_v0 }
  0x3c   :  { %159 = vmatpush1.bf16.msra.mxu0 %v401_v16 }
  0x3d   :  { %160 = vmatprep.subr.bf16.mxu0 %v436_v0 }
  0x40   :  { %161 = vmatpush1.bf16.msra.mxu0 %v402_v17 }
  0x43   :  { %171 = vmatmul.mubr.bf16.vlgmr.msra.gmra.mrb[0].mxu0 %v31_v19 }
 0x116   :  { %v172_v23 = vpop.f32.mrb[0].mxu0 }
 0x117   :  { %v173_v24 = vadd.f32 %v333_v22, %v172_v23  ;;  %v174_v25 = vpop.f32.mrb[1].mxu0 }
 0x118   :  { %v175_v26 = vpop.f32.mrb[2].mxu0 }
 0x119   :  { %v178_v27 = vmax.f32 %v173_v24, 0.0  ;;  %v176_v28 = vpop.f32.mrb[3].mxu0 }
 0x11b   :  { %v179_v30 = vpack.c.bf16 %v178_v27, %v178_v27 }
 0x11d   :  { %374 = vmatmul.mubr.msk.bf16.vlgmr.msra.gmra.mrb[0].mxu1 %vm134_vm0, %v179_v30 }
 0x11e   :  { %378 = vmatpush3.bf16.msra.mxu1 %v407_v29  ;;  %381 = vmatprep.mubr.msk.bf16.mxu1 %vm438_vm1, %v437_v1 }
 0x11f   :  { %379 = vmatprep.subr.bf16.mxu1 %v437_v1 }
 0x122   :  { %380 = vmatpush3.bf16.msra.mxu1 %v408_v31 }
 0x1f0   :  { %v254_v33 = vpop.f32.mrb[0].mxu1 }
 0x1f1   :  { %v255_v34 = vadd.f32 %v347_v32, %v254_v33  ;;  %v375_v35 = vpop.f32.mrb[1].mxu1 }
 0x1f2   :  { %v257_v36 = vpop.f32.mrb[2].mxu1 }
 0x1f3   :  { %v260_v37 = vmax.f32 %v255_v34, 0.0  ;;  %v376_v38 = vpop.f32.mrb[3].mxu1 }
 0x1f5   :  { %v261_v39 = vpack.c.bf16 %v260_v37, %v260_v37 }
 0x1f7   :  { %382 = vmatmul.mubr.msk.bf16.vlgmr.msra.gmra.mrb[4].mxu1 %vm283_vm2, %v261_v39 }
 0x2ca   :  { %v321_v41 = vpop.f32.mrb[4].mxu1 }
 0x2cb   :  { %v322_v42 = vadd.f32 %v353_v40, %v321_v41  ;;  %v383_v43 = vpop.f32.mrb[5].mxu1 }
 0x2cc   :  { %v324_v44 = vpop.f32.mrb[6].mxu1 }
 0x2cd   :  { %327 = vst [vmem:[%s502_s3] sm:$0xff] %v322_v42  ;;  %v384_v45 = vpop.f32.mrb[7].mxu1 }
 0x2ce   :  { %332 = vsyncpa [#allocation3], 1 }

</bundles_post_ra>
